<compile_context>
chip_gen: v5e
topology: v5e:2x2
jax: 0.10.0
libtpu: 0.0.40
codegen_flags: <defaults>
</compile_context>

<pallas_src>
from functools import lru_cache

import numpy as np
import jax
import jax.numpy as jnp
from jax.experimental import pallas as pl
from jax.experimental.pallas import tpu as pltpu

KERNEL_SIZE = 21
SIGMA = 4.0
PAD = KERNEL_SIZE // 2          # 10
_LANES = 128                    # TPU vreg lane width
_COMPUTE_DTYPE = jnp.bfloat16   # MXU operand dtype (accumulation stays f32)


def _gaussian_1d(kernel_size: int = KERNEL_SIZE, sigma: float = SIGMA) -> np.ndarray:
    """1D factor of the torch 2D kernel: K2d = outer(k1, k1) with k1 = g / sum(g)."""
    c = np.arange(kernel_size, dtype=np.float64) - kernel_size // 2
    g = np.exp(-(c ** 2) / (2.0 * sigma ** 2))
    return g / g.sum()


_K1D = _gaussian_1d()


def create_gaussian_kernel_2d(kernel_size: int = KERNEL_SIZE, sigma: float = SIGMA) -> np.ndarray:
    """Exact reproduction of NativeGaussianBlur.create_gaussian_kernel (single channel)."""
    coords = np.arange(kernel_size, dtype=np.float32) - kernel_size // 2
    x = np.tile(coords[None, :], (kernel_size, 1))
    y = x.T
    gaussian = np.exp(-(x ** 2 + y ** 2) / (2.0 * sigma ** 2)).astype(np.float32)
    return (gaussian / gaussian.sum()).astype(np.float32)


def _blur_matrix(n: int) -> np.ndarray:
    """Banded Toeplitz blur matrix A (n, n): A[o, i] = k1[i - o + PAD] for |i - o| <= PAD.

    Multiplying along one spatial axis == 1D Gaussian cross-correlation with zero
    padding (out-of-image taps fall outside the band), so padding is never
    materialized.
    """
    o = np.arange(n)[:, None]
    i = np.arange(n)[None, :]
    d = i - o + PAD
    valid = (d >= 0) & (d < KERNEL_SIZE)
    vals = _K1D[np.clip(d, 0, KERNEL_SIZE - 1)]
    return np.where(valid, vals, 0.0).astype(np.float32)


@lru_cache(maxsize=None)
def _blur_operators(H: int, W: int, G: int):
    """Cached device arrays: A_h (H,H) and block-diagonal A_w^T (G*W, G*W), bf16."""
    ah = _blur_matrix(H)
    awt = _blur_matrix(W).T
    if G > 1:
        # Block-diagonal so lane-packed images never blur into each other.
        awt = np.kron(np.eye(G, dtype=np.float32), awt)
    return (jnp.asarray(ah, dtype=_COMPUTE_DTYPE),
            jnp.asarray(awt, dtype=_COMPUTE_DTYPE))


def _vmem_capacity_bytes() -> int:
    try:
        return int(pltpu.get_tpu_info().vmem_capacity_bytes)
    except Exception:
        return 64 * 1024 * 1024   # conservative fallback (v7x per-core VMEM)


def _pack_factor(n_images: int, W: int) -> int:
    """Largest G <= 128 // W that divides n_images (G = 1 when W >= 128)."""
    if W >= _LANES:
        return 1
    gmax = max(1, min(n_images, _LANES // W))
    for g in range(gmax, 0, -1):
        if n_images % g == 0:
            return g
    return 1


def _blur_kernel(x_ref, ah_ref, awt_ref, o_ref):
    """One block of tile_n lane-packed images.

    x_ref  : (tile_n, H, Wp) input images (Wp = G*W, G images packed along lanes)
    ah_ref : (H, H)   vertical blur matrix A_h                (bf16)
    awt_ref: (Wp, Wp) block-diagonal horizontal blur A_w^T    (bf16)
    o_ref  : (tile_n, H, Wp)
    out[n] = A_h @ x[n] @ A_w^T   (zero padding folded into the bands)
    """
    n, H, Wp = x_ref.shape
    x = x_ref[...].astype(_COMPUTE_DTYPE)

    # Horizontal pass: ONE flat MXU matmul, M = tile_n*H (contiguous reshape), N = Wp.
    y = jnp.dot(x.reshape(n * H, Wp), awt_ref[...],
                preferred_element_type=jnp.float32)
    y = y.reshape(n, H, Wp).astype(_COMPUTE_DTYPE)

    # Vertical pass: ONE batched contraction over the image axis (A_h shared).
    ah = jnp.broadcast_to(ah_ref[...], (n, H, H))
    out = jnp.einsum("nhk,nkw->nhw", ah, y, preferred_element_type=jnp.float32)

    o_ref[...] = out.astype(o_ref.dtype)


@jax.jit
def native_gaussian_blur(x):
    """x: (B, C, H, W) float -> depthwise Gaussian blur (k=21, sigma=4, zero pad 10)."""
    B, C, H, W = x.shape
    BC = B * C

    # Lane packing: for small images place G of them side by side along the lane
    # axis so VMEM tiles / stores are lane-dense and the MXU N dim is filled.
    G = _pack_factor(BC, W)
    N = BC // G
    Wp = G * W

    xf = x.reshape(BC, H, W)
    if G > 1:
        xf = xf.reshape(N, G, H, W).transpose(0, 2, 1, 3).reshape(N, H, Wp)

    ah, awt = _blur_operators(H, W, G)

    # Tile size: ~VMEM/16 bytes of input images per block (double-buffered in/out
    # blocks + bf16 temporaries + blur matrices stay inside the raised VMEM
    # limit); also cap tile_n so there are >= 2 grid steps when possible so the
    # 'parallel' axis can be sharded across v7x's two TensorCores.
    cap = _vmem_capacity_bytes()
    per_img_bytes = H * Wp * x.dtype.itemsize
    tile_n = max(1, min(N, (cap // 16) // max(per_img_bytes, 1)))
    if N >= 2:
        tile_n = min(tile_n, (N + 1) // 2)
    n_blocks = (N + tile_n - 1) // tile_n   # partial last block: Pallas masks it

    flops = 2 * N * H * Wp * (H + Wp)
    bytes_accessed = (2 * N * H * Wp * x.dtype.itemsize
                      + (H * H + Wp * Wp) * 2)

    # TODO(synk): for very large images (H or W >~ 512-1024) replace the dense
    # (H,H)/(Wp,Wp) operators with a block-banded contraction (visit only the <=2
    # diagonal band blocks per output tile, or row-tile with a 2*PAD halo) so
    # FLOPs/pixel stay constant and the operators do not outgrow VMEM (esp. v7x).
    # TODO(synk): in that same large-H/W regime, single-buffer the grid-invariant
    # ah/awt blocks (pl.Buffered(1) or a manual copy) to reclaim their second
    # pipeline buffer; at the shapes exercised here the waste is negligible.
    out = pl.pallas_call(
        _blur_kernel,
        out_shape=jax.ShapeDtypeStruct((N, H, Wp), x.dtype),
        grid=(n_blocks,),
        in_specs=[
            pl.BlockSpec((tile_n, H, Wp), lambda i: (i, 0, 0)),
            pl.BlockSpec((H, H), lambda i: (0, 0)),
            pl.BlockSpec((Wp, Wp), lambda i: (0, 0)),
        ],
        out_specs=pl.BlockSpec((tile_n, H, Wp), lambda i: (i, 0, 0)),
        compiler_params=pltpu.CompilerParams(
            dimension_semantics=("parallel",),
            vmem_limit_bytes=int(cap * 3 // 4),
        ),
        cost_estimate=pl.CostEstimate(
            flops=int(flops), transcendentals=0, bytes_accessed=int(bytes_accessed)),
    )(xf, ah, awt)

    if G > 1:
        out = out.reshape(N, H, G, W).transpose(0, 2, 1, 3)
    return out.reshape(B, C, H, W)


def _reference_blur(x):
    """Pure-JAX reference (grouped conv), used only as a correctness check."""
    B, C, H, W = x.shape
    w = jnp.asarray(create_gaussian_kernel_2d())[None, None].repeat(C, axis=0)  # (C,1,K,K)
    return jax.lax.conv_general_dilated(
        x, w,
        window_strides=(1, 1),
        padding=((PAD, PAD), (PAD, PAD)),
        dimension_numbers=("NCHW", "OIHW", "NCHW"),
        feature_group_count=C,
        precision=jax.lax.Precision.HIGHEST,
    )


if __name__ == "__main__":
    key = jax.random.PRNGKey(0)
    B, C, H, W = 2, 4, 16, 16
    x = jax.random.normal(key, (B, C, H, W), dtype=jnp.float32)

    out = jax.block_until_ready(native_gaussian_blur(x))
    ref = jax.block_until_ready(_reference_blur(x))

    # Separable banded formulation is algebraically identical to the depthwise
    # conv; tolerance covers bf16 MXU operands (f32 accumulation) vs the f32
    # conv reference.
    np.testing.assert_allclose(np.asarray(out, dtype=np.float32),
                               np.asarray(ref, dtype=np.float32),
                               rtol=1e-2, atol=1e-2)

    print("KERNEL_OK")
</pallas_src>

<mosaic_0001>
module attributes {stable_mosaic.version = 11 : i64} {
  func.func @_blur_kernel(%arg0: i32, %arg1: memref<1x16x128xf32, #tpu.memory_space<vmem>>, %arg2: memref<16x16xbf16, #tpu.memory_space<vmem>>, %arg3: memref<128x128xbf16, #tpu.memory_space<vmem>>, %arg4: memref<1x16x128xf32, #tpu.memory_space<vmem>>) attributes {dimension_semantics = [#tpu.dimension_semantics<parallel>], iteration_bounds = array<i64: 1>, scalar_prefetch = 0 : i64, scratch_operands = 0 : i64, tpu.core_type = #tpu.core_type<tc>, window_params = [{transform_indices = @transform_0, window_bounds = array<i64: 1, 16, 128>}, {pipeline_mode = #tpu.pipeline_mode<synchronous>, transform_indices = @transform_1, window_bounds = array<i64: 16, 16>}, {pipeline_mode = #tpu.pipeline_mode<synchronous>, transform_indices = @transform_2, window_bounds = array<i64: 128, 128>}, {transform_indices = @transform_3, window_bounds = array<i64: 1, 16, 128>}]} {
    %c0 = arith.constant 0 : index
    %c0_0 = arith.constant 0 : index
    %c0_1 = arith.constant 0 : index
    %0 = vector.load %arg1[%c0, %c0_0, %c0_1] : memref<1x16x128xf32, #tpu.memory_space<vmem>>, vector<1x16x128xf32>
    %1 = arith.truncf %0 : vector<1x16x128xf32> to vector<1x16x128xbf16>
    %2 = vector.shape_cast %1 : vector<1x16x128xbf16> to vector<16x128xbf16>
    %c0_2 = arith.constant 0 : index
    %c0_3 = arith.constant 0 : index
    %3 = vector.load %arg3[%c0_2, %c0_3] : memref<128x128xbf16, #tpu.memory_space<vmem>>, vector<128x128xbf16>
    %cst = arith.constant dense<0.000000e+00> : vector<16x128xf32>
    %4 = tpu.matmul %2, %3, %cst {dimension_numbers = #tpu.dot_dimension_numbers<[1], [0], [0], [1], [0, 0, 1, 1], [], []>} : vector<16x128xbf16>, vector<128x128xbf16>, vector<16x128xf32> -> vector<16x128xf32>
    %5 = vector.shape_cast %4 : vector<16x128xf32> to vector<1x16x128xf32>
    %6 = arith.truncf %5 : vector<1x16x128xf32> to vector<1x16x128xbf16>
    %c0_4 = arith.constant 0 : index
    %c0_5 = arith.constant 0 : index
    %7 = vector.load %arg2[%c0_4, %c0_5] : memref<16x16xbf16, #tpu.memory_space<vmem>>, vector<16x16xbf16>
    %8 = vector.shape_cast %7 : vector<16x16xbf16> to vector<1x16x16xbf16>
    "tpu.trace_start"() <{level = 10 : i32, message = "nhk,nkw->nhw"}> : () -> ()
    %cst_6 = arith.constant dense<0.000000e+00> : vector<1x16x128xf32>
    %9 = tpu.matmul %8, %6, %cst_6 {dimension_numbers = #tpu.dot_dimension_numbers<[2], [1], [1], [2], [0, 0, 0, 1, 1, 2], [0], [0]>} : vector<1x16x16xbf16>, vector<1x16x128xbf16>, vector<1x16x128xf32> -> vector<1x16x128xf32>
    "tpu.trace_stop"() : () -> ()
    %c0_7 = arith.constant 0 : index
    %c0_8 = arith.constant 0 : index
    %c0_9 = arith.constant 0 : index
    %10 = vector.load %arg4[%c0_7, %c0_8, %c0_9] : memref<1x16x128xf32, #tpu.memory_space<vmem>>, vector<1x16x128xf32>
    tpu.vector_store %arg4[%c0_7, %c0_8, %c0_9], %9 {strides = array<i32>} : memref<1x16x128xf32, #tpu.memory_space<vmem>>, vector<1x16x128xf32>,
    return
  }
  func.func @transform_0(%arg0: i32) -> (i32, i32, i32) {
    %c0_i32 = arith.constant 0 : i32
    %c0_i32_0 = arith.constant 0 : i32
    %c0_i32_1 = arith.constant 0 : i32
    return %arg0, %c0_i32, %c0_i32_0 : i32, i32, i32
  }
  func.func @transform_1(%arg0: i32) -> (i32, i32) {
    %c0_i32 = arith.constant 0 : i32
    %c0_i32_0 = arith.constant 0 : i32
    %c0_i32_1 = arith.constant 0 : i32
    return %c0_i32, %c0_i32_0 : i32, i32
  }
  func.func @transform_2(%arg0: i32) -> (i32, i32) {
    %c0_i32 = arith.constant 0 : i32
    %c0_i32_0 = arith.constant 0 : i32
    %c0_i32_1 = arith.constant 0 : i32
    return %c0_i32, %c0_i32_0 : i32, i32
  }
  func.func @transform_3(%arg0: i32) -> (i32, i32, i32) {
    %c0_i32 = arith.constant 0 : i32
    %c0_i32_0 = arith.constant 0 : i32
    %c0_i32_1 = arith.constant 0 : i32
    return %arg0, %c0_i32, %c0_i32_0 : i32, i32, i32
  }
}

</mosaic_0001>

<bundles_post_ra>
// kernel: native_gaussian_blur.1
= control target key start
LH: loop header
LB: loop body
LE: loop exit
PB: predicated region body
PF: predicated region fallthrough
CT: control target
= control target key end

     0   :  { %vm118_vm0 = vcmask 130048   ;;  %s247_s2 = inlined_call_operand.vmem [shape: bf16[128,128], index: 2, kind: input, shape index: {}]   ;;  %s248_s0 = inlined_call_operand.vmem [shape: f32[1,16,128], index: 0, kind: input, shape index: {}]   ;;  %s249_s1 = inlined_call_operand.vmem [shape: bf16[16,16], index: 1, kind: input, shape index: {}]   ;;  %s250_s3 = inlined_call_operand.vmem [shape: f32[1,16,128], index: 3, kind: output, shape index: {}]  }
   0x1   :  { %v186_v0 = vld [vmem:[%s247_s2 + $0x38] sm:$0xff]  ;;  %v185_v1 = vld [vmem:[%s247_s2 + $0x30] sm:$0xff]  ;;  %v184_v2 = vld [vmem:[%s247_s2 + $0x28] sm:$0xff] }
   0x2   :  { %89 = vmatpush.bf16.msra.mxu0 %v186_v0  ;;  %v183_v3 = vld [vmem:[%s247_s2 + $0x20] sm:$0xff]  ;;  %v182_v4 = vld [vmem:[%s247_s2 + $0x18] sm:$0xff]  ;;  %v181_v5 = vld [vmem:[%s247_s2 + $0x10] sm:$0xff] }
   0x3   :  { %v15_v6 = vld [vmem:[%s248_s0] sm:$0xff]  ;;  %v16_v7 = vld [vmem:[%s248_s0 + $0x8] sm:$0xff] }
   0x4   :  { %v17_v8 = vpack.c.bf16 %v15_v6, %v15_v6  ;;  %v18_v9 = vpack.c.bf16 %v16_v7, %v16_v7  ;;  %v180_v10 = vld [vmem:[%s247_s2 + $0x8] sm:$0xff]  ;;  %v179_v13 = vld [vmem:[%s247_s2] sm:$0xff] }
   0x5   :  { %v187_v22 = vld [vmem:[%s249_s1] sm:$0xff] }
   0x6   :  { %90 = vmatpush.bf16.msra.mxu0 %v185_v1  ;;  %v37_v11 = vunpack.c.l.b16 %v17_v8  ;;  %v38_v12 = vunpack.c.l.b16 %v18_v9 }
   0x8   :  { %v39_v14 = vpack.c.b16 %v38_v12, %v37_v11 }
   0xa   :  { %91 = vmatpush.bf16.msra.mxu0 %v184_v2 }
   0xe   :  { %92 = vmatpush.bf16.msra.mxu0 %v183_v3 }
  0x12   :  { %93 = vmatpush.bf16.msra.mxu0 %v182_v4 }
  0x16   :  { %94 = vmatpush.bf16.msra.mxu0 %v181_v5 }
  0x1a   :  { %95 = vmatpush.bf16.msra.mxu0 %v180_v10 }
  0x1e   :  { %96 = vmatpush.bf16.msra.mxu0 %v179_v13 }
  0x21   :  { %97 = vmatmul.bf16.vlgmr.msra.gmra.mxu0 %v39_v14 }
  0x9e   :  { %v98_v15 = vpop.f32.mrf.mxu0 }
  0x9f   :  { %v103_v16 = vpack.c.bf16 %v98_v15, %v98_v15 }
  0xa1   :  { %v114_v19 = vunpack.c.l.b16 %v103_v16 }
  0xa6   :  { %v100_v17 = vpop.f32.mrf.mxu0 }
  0xa7   :  { %v104_v18 = vpack.c.bf16 %v100_v17, %v100_v17 }
  0xa9   :  { %v115_v20 = vunpack.c.l.b16 %v104_v18 }
  0xab   :  { %v116_v21 = vpack.c.b16 %v115_v20, %v114_v19 }
  0xad   :  { %129 = vmatpush.bf16.msra.mxu1 %v116_v21 }
  0xb0   :  { %178 = vmatmul.msk.bf16.vlgmr.msra.gmra.mxu1 %vm118_vm0, %v187_v22 }
 0x12d   :  { %v131_v23 = vpop.f32.mrf.mxu1 }
 0x12e   :  { %136 = vst [vmem:[%s250_s3] sm:$0xff] %v131_v23 }
 0x135   :  { %v133_v24 = vpop.f32.mrf.mxu1 }
 0x136   :  { %137 = vst [vmem:[%s250_s3 + $0x8] sm:$0xff] %v133_v24 }

</bundles_post_ra>
